<compile_context>
chip_gen: v7x
topology: tpu7x:2x2x1
jax: 0.10.0
libtpu: 0.0.40
codegen_flags: <defaults>
</compile_context>

<pallas_src>
import functools
import math

import jax
import jax.numpy as jnp
from jax.experimental import pallas as pl
from jax.experimental.pallas import tpu as pltpu

_EPS = 1e-5


def _round_up(x, m):
    return ((x + m - 1) // m) * m


def _choose_tile_rows(n_rows, width_lanes):
    """8-aligned row tile targeting ~2 MiB of f32 per block, >= 2 grid steps."""
    target_bytes = 2 * 1024 * 1024          # ~85% of HBM roofline already here
    tr = target_bytes // max(width_lanes * 4, 1)
    tr = max(8, min(tr, 2048))
    tr = (tr // 8) * 8
    if n_rows >= 16:
        # Ensure at least 2 grid steps so both v7x TensorCores get rows
        # (one extra ~0.35 us step is a no-op cost on single-TC v5e/v6e).
        tr = min(tr, _round_up(pl.cdiv(n_rows, 2), 8))
    tr = min(tr, _round_up(n_rows, 8))
    return max(8, tr)


# --------------------------------------------------------------------------
# Kernel bodies
# --------------------------------------------------------------------------

def _ln_rows_kernel(x_ref, w_ref, b_ref, o_ref):
    """Per-row LayerNorm; rows on sublanes, C (>=128-friendly) on lanes."""
    x = x_ref[...].astype(jnp.float32)
    inv_c = jnp.float32(1.0 / x.shape[-1])
    mu = jnp.sum(x, axis=-1, keepdims=True) * inv_c
    xc = x - mu
    var = jnp.sum(xc * xc, axis=-1, keepdims=True) * inv_c
    inv = jax.lax.rsqrt(var + _EPS)
    o_ref[...] = (xc * inv * w_ref[...] + b_ref[...]).astype(o_ref.dtype)


def _ln_grouped_kernel(x_ref, m_ref, w_ref, b_ref, o_ref, *, inv_c):
    """g rows folded per super-row of width W = g*C (multiple of 128).

    m_ref is the (W, W) block-diagonal 0/1 matrix: (x @ M)[:, k] is the sum of
    x over the C-lane group containing lane k, broadcast back to every lane of
    that group — a segmented reduction on the otherwise-idle MXU, keeping all
    VPU work and all stores lane-dense.
    """
    x = x_ref[...].astype(jnp.float32)
    m = m_ref[...]
    mu = jnp.dot(x, m, preferred_element_type=jnp.float32) * inv_c
    xc = x - mu
    var = jnp.dot(xc * xc, m, preferred_element_type=jnp.float32) * inv_c
    inv = jax.lax.rsqrt(var + _EPS)
    o_ref[...] = (xc * inv * w_ref[...] + b_ref[...]).astype(o_ref.dtype)


# --------------------------------------------------------------------------
# pallas_call wrappers
# --------------------------------------------------------------------------

def _ln_rows(x2d, w32, b32, io_bytes):
    rows, C = x2d.shape
    tr = _choose_tile_rows(rows, C)
    grid = (pl.cdiv(rows, tr),)

    cost = pl.CostEstimate(
        flops=int(10 * rows * C),
        transcendentals=int(rows),
        bytes_accessed=int(2 * rows * C * io_bytes + 2 * C * 4),
    )
    return pl.pallas_call(
        _ln_rows_kernel,
        out_shape=jax.ShapeDtypeStruct((rows, C), x2d.dtype),
        grid_spec=pltpu.PrefetchScalarGridSpec(
            num_scalar_prefetch=0,
            grid=grid,
            in_specs=[
                pl.BlockSpec((tr, C), lambda i: (i, 0)),
                # Constant block index -> params stay VMEM-resident.
                pl.BlockSpec((1, C), lambda i: (0, 0)),
                pl.BlockSpec((1, C), lambda i: (0, 0)),
            ],
            out_specs=pl.BlockSpec((tr, C), lambda i: (i, 0)),
        ),
        compiler_params=pltpu.CompilerParams(
            dimension_semantics=("parallel",),
        ),
        cost_estimate=cost,
    )(x2d, w32.reshape(1, C), b32.reshape(1, C))


def _ln_folded(x2d, w32, b32, g, io_bytes):
    rows, C = x2d.shape
    W = g * C                                  # multiple of 128 by construction

    rows_p = _round_up(rows, g)
    xf = x2d
    if rows_p != rows:
        # Small pad (< g <= 128 rows) only so the free row-major fold works —
        # never padded to the tile size.  Zero rows normalize to finite values
        # (var=0 -> rsqrt(eps)) and are sliced off below.
        xf = jnp.pad(xf, ((0, rows_p - rows), (0, 0)))
    n_super = rows_p // g
    xf = xf.reshape(n_super, W)                # free: contiguous row-major fold

    tr = _choose_tile_rows(n_super, W)
    grid = (pl.cdiv(n_super, tr),)

    # Block-diagonal 0/1 group-sum matrix (exactly representable; f32 matmul).
    lane_group = jnp.arange(W, dtype=jnp.int32) // C
    gmat = (lane_group[:, None] == lane_group[None, :]).astype(jnp.float32)

    w_t = jnp.tile(w32, g).reshape(1, W)
    b_t = jnp.tile(b32, g).reshape(1, W)

    cost = pl.CostEstimate(
        flops=int(10 * rows_p * C + 4 * n_super * W * W),
        transcendentals=int(rows_p),
        bytes_accessed=int(2 * rows_p * C * io_bytes + (W * W + 2 * W) * 4),
    )
    kernel = functools.partial(_ln_grouped_kernel, inv_c=float(1.0 / C))
    out = pl.pallas_call(
        kernel,
        out_shape=jax.ShapeDtypeStruct((n_super, W), x2d.dtype),
        grid_spec=pltpu.PrefetchScalarGridSpec(
            num_scalar_prefetch=0,
            grid=grid,
            in_specs=[
                pl.BlockSpec((tr, W), lambda i: (i, 0)),
                pl.BlockSpec((W, W), lambda i: (0, 0)),   # resident constant
                pl.BlockSpec((1, W), lambda i: (0, 0)),
                pl.BlockSpec((1, W), lambda i: (0, 0)),
            ],
            out_specs=pl.BlockSpec((tr, W), lambda i: (i, 0)),
        ),
        compiler_params=pltpu.CompilerParams(
            dimension_semantics=("parallel",),
        ),
        cost_estimate=cost,
    )(xf, gmat, w_t, b_t)

    out = out.reshape(rows_p, C)
    if rows_p != rows:
        out = out[:rows]
    return out


def with_bias_layernorm(x, weight, bias):
    """LayerNorm over the last dim, affine weight & bias, eps=1e-5.

    Matches PyTorch WithBias_LayerNorm: population variance (unbiased=False),
    eps inside the sqrt.
    """
    orig_shape = x.shape
    C = orig_shape[-1]
    assert weight.shape == (C,) and bias.shape == (C,)

    rows = 1
    for d in orig_shape[:-1]:
        rows *= int(d)
    x2d = x.reshape(rows, C)
    io_bytes = jnp.dtype(x.dtype).itemsize

    # Cast the tiny params to f32 once, outside the kernel.
    w32 = weight.astype(jnp.float32)
    b32 = bias.astype(jnp.float32)

    # Smallest fold factor g with (g*C) % 128 == 0.
    g = 128 // math.gcd(C, 128)
    use_fold = (C % 128 != 0) and (g * C <= 512)

    if use_fold:
        out2d = _ln_folded(x2d, w32, b32, g, io_bytes)
    else:
        out2d = _ln_rows(x2d, w32, b32, io_bytes)
    return out2d.reshape(orig_shape)


# --------------------------------------------------------------------------
# Reference + self-check
# --------------------------------------------------------------------------

def _reference(x, weight, bias):
    mu = jnp.mean(x, axis=-1, keepdims=True)
    var = jnp.mean((x - mu) ** 2, axis=-1, keepdims=True)
    return (x - mu) / jnp.sqrt(var + _EPS) * weight + bias


if __name__ == "__main__":
    keys = jax.random.split(jax.random.PRNGKey(0), 8)

    def check(x, w, b, name):
        y = jax.block_until_ready(with_bias_layernorm(x, w, b))
        y_ref = _reference(x, w, b)
        assert y.shape == x.shape and y.dtype == x.dtype, f"shape/dtype ({name})"
        assert jnp.allclose(y, y_ref, atol=2e-5, rtol=2e-5), \
            f"mismatch vs reference ({name})"

    # 1) Typical SCTB usage shape (batch, seq=H*W, hidden): folded lane-dense
    #    path (C=32 -> g=4, W=128), even rows, no padding.
    B, S, C = 2, 64, 32
    x = jax.random.normal(keys[0], (B, S, C), dtype=jnp.float32)
    w = jnp.ones((C,), dtype=jnp.float32)
    b = jnp.zeros((C,), dtype=jnp.float32)
    check(x, w, b, "folded, even rows")

    # 2) Folded path with rows not a multiple of g (small pad) and a ragged
    #    last grid block, plus non-trivial affine params.
    x2 = jax.random.normal(keys[1], (3, 50, C), dtype=jnp.float32)
    w2 = jax.random.normal(keys[2], (C,), dtype=jnp.float32)
    b2 = jax.random.normal(keys[3], (C,), dtype=jnp.float32)
    check(x2, w2, b2, "folded, padded + ragged block")

    # 3) C multiple of 128 -> simple per-row path; rows % tile != 0 exercises
    #    masked stores of the ragged last block (garbage rows never stored).
    C3 = 256
    x3 = jax.random.normal(keys[4], (2, 17, C3), dtype=jnp.float32)
    w3 = jax.random.normal(keys[5], (C3,), dtype=jnp.float32)
    b3 = jax.random.normal(keys[6], (C3,), dtype=jnp.float32)
    check(x3, w3, b3, "per-row, ragged block")

    # 4) C=48 (real SCTB dim): folded path with g=8, W=384.
    C4 = 48
    x4 = jax.random.normal(keys[7], (2, 8, C4), dtype=jnp.float32)
    w4 = jnp.full((C4,), 0.5, dtype=jnp.float32)
    b4 = jnp.full((C4,), 0.1, dtype=jnp.float32)
    check(x4, w4, b4, "folded, W=384")

    print("KERNEL_OK")
</pallas_src>

<mosaic_0001>
module attributes {stable_mosaic.version = 11 : i64} {
  func.func @_ln_grouped_kernel(%arg0: i32, %arg1: memref<16x128xf32, #tpu.memory_space<vmem>>, %arg2: memref<128x128xf32, #tpu.memory_space<vmem>>, %arg3: memref<1x128xf32, #tpu.memory_space<vmem>>, %arg4: memref<1x128xf32, #tpu.memory_space<vmem>>, %arg5: memref<16x128xf32, #tpu.memory_space<vmem>>) attributes {dimension_semantics = [#tpu.dimension_semantics<parallel>], iteration_bounds = array<i64: 2>, scalar_prefetch = 0 : i64, scratch_operands = 0 : i64, tpu.core_type = #tpu.core_type<tc>, window_params = [{transform_indices = @transform_0, window_bounds = array<i64: 16, 128>}, {pipeline_mode = #tpu.pipeline_mode<synchronous>, transform_indices = @transform_1, window_bounds = array<i64: 128, 128>}, {pipeline_mode = #tpu.pipeline_mode<synchronous>, transform_indices = @transform_2, window_bounds = array<i64: 1, 128>}, {pipeline_mode = #tpu.pipeline_mode<synchronous>, transform_indices = @transform_3, window_bounds = array<i64: 1, 128>}, {transform_indices = @transform_4, window_bounds = array<i64: 16, 128>}]} {
    %c0 = arith.constant 0 : index
    %c0_0 = arith.constant 0 : index
    %0 = vector.load %arg1[%c0, %c0_0] : memref<16x128xf32, #tpu.memory_space<vmem>>, vector<16x128xf32>
    %c0_1 = arith.constant 0 : index
    %c0_2 = arith.constant 0 : index
    %1 = vector.load %arg2[%c0_1, %c0_2] : memref<128x128xf32, #tpu.memory_space<vmem>>, vector<128x128xf32>
    %cst = arith.constant dense<0.000000e+00> : vector<16x128xf32>
    %2 = tpu.matmul %0, %1, %cst {dimension_numbers = #tpu.dot_dimension_numbers<[1], [0], [0], [1], [0, 0, 1, 1], [], []>} : vector<16x128xf32>, vector<128x128xf32>, vector<16x128xf32> -> vector<16x128xf32>
    %cst_3 = arith.constant 3.125000e-02 : f32
    %3 = vector.broadcast %cst_3 : f32 to vector<16x128xf32>
    %4 = arith.mulf %2, %3 : vector<16x128xf32>
    %5 = arith.subf %0, %4 : vector<16x128xf32>
    %6 = arith.mulf %5, %5 : vector<16x128xf32>
    %cst_4 = arith.constant dense<0.000000e+00> : vector<16x128xf32>
    %7 = tpu.matmul %6, %1, %cst_4 {dimension_numbers = #tpu.dot_dimension_numbers<[1], [0], [0], [1], [0, 0, 1, 1], [], []>} : vector<16x128xf32>, vector<128x128xf32>, vector<16x128xf32> -> vector<16x128xf32>
    %cst_5 = arith.constant 3.125000e-02 : f32
    %8 = vector.broadcast %cst_5 : f32 to vector<16x128xf32>
    %9 = arith.mulf %7, %8 : vector<16x128xf32>
    %cst_6 = arith.constant 9.99999974E-6 : f32
    %10 = vector.broadcast %cst_6 : f32 to vector<16x128xf32>
    %11 = arith.addf %9, %10 : vector<16x128xf32>
    %12 = math.rsqrt %11 : vector<16x128xf32>
    %13 = arith.mulf %5, %12 : vector<16x128xf32>
    %c0_7 = arith.constant 0 : index
    %c0_8 = arith.constant 0 : index
    %14 = vector.load %arg3[%c0_7, %c0_8] : memref<1x128xf32, #tpu.memory_space<vmem>>, vector<1x128xf32>
    %15 = vector.broadcast %14 : vector<1x128xf32> to vector<16x128xf32>
    %16 = arith.mulf %13, %15 : vector<16x128xf32>
    %c0_9 = arith.constant 0 : index
    %c0_10 = arith.constant 0 : index
    %17 = vector.load %arg4[%c0_9, %c0_10] : memref<1x128xf32, #tpu.memory_space<vmem>>, vector<1x128xf32>
    %18 = vector.broadcast %17 : vector<1x128xf32> to vector<16x128xf32>
    %19 = arith.addf %16, %18 : vector<16x128xf32>
    %c0_11 = arith.constant 0 : index
    %c0_12 = arith.constant 0 : index
    %20 = vector.load %arg5[%c0_11, %c0_12] : memref<16x128xf32, #tpu.memory_space<vmem>>, vector<16x128xf32>
    tpu.vector_store %arg5[%c0_11, %c0_12], %19 {strides = array<i32>} : memref<16x128xf32, #tpu.memory_space<vmem>>, vector<16x128xf32>,
    return
  }
  func.func @transform_0(%arg0: i32) -> (i32, i32) {
    %c0_i32 = arith.constant 0 : i32
    %c0_i32_0 = arith.constant 0 : i32
    return %arg0, %c0_i32 : i32, i32
  }
  func.func @transform_1(%arg0: i32) -> (i32, i32) {
    %c0_i32 = arith.constant 0 : i32
    %c0_i32_0 = arith.constant 0 : i32
    %c0_i32_1 = arith.constant 0 : i32
    return %c0_i32, %c0_i32_0 : i32, i32
  }
  func.func @transform_2(%arg0: i32) -> (i32, i32) {
    %c0_i32 = arith.constant 0 : i32
    %c0_i32_0 = arith.constant 0 : i32
    %c0_i32_1 = arith.constant 0 : i32
    return %c0_i32, %c0_i32_0 : i32, i32
  }
  func.func @transform_3(%arg0: i32) -> (i32, i32) {
    %c0_i32 = arith.constant 0 : i32
    %c0_i32_0 = arith.constant 0 : i32
    %c0_i32_1 = arith.constant 0 : i32
    return %c0_i32, %c0_i32_0 : i32, i32
  }
  func.func @transform_4(%arg0: i32) -> (i32, i32) {
    %c0_i32 = arith.constant 0 : i32
    %c0_i32_0 = arith.constant 0 : i32
    return %arg0, %c0_i32 : i32, i32
  }
}

</mosaic_0001>

<bundles_post_ra>
// kernel: tpu_custom_call.1
= control target key start
LH: loop header
LB: loop body
LE: loop exit
PB: predicated region body
PF: predicated region fallthrough
CT: control target
= control target key end

     0   :  { %9 = vsyncpa [#allocation3], 0  ;;  %s1170_s0 = inlined_call_operand.hbm [shape: f32[32,128], index: 0, kind: input, shape index: {}]   ;;  %s1171_s1 = inlined_call_operand.hbm [shape: f32[128,128], index: 1, kind: input, shape index: {}]   ;;  %s1172_s2 = inlined_call_operand.vmem [shape: f32[1,128], index: 2, kind: input, shape index: {}]   ;;  %s1173_s3 = inlined_call_operand.vmem [shape: f32[1,128], index: 3, kind: input, shape index: {}]   ;;  %s1174_s4 = inlined_call_operand.hbm [shape: f32[32,128], index: 4, kind: output, shape index: {}]  }
   0x1   :  { %11 = vsyncpa [#allocation3 + $0x1], 0 }
   0x2   :  { %12 = vsyncpa [#allocation6], 0 }
   0x3   :  { %13 = vsyncpa [#allocation4], 0 }
   0x4   :  { %15 = vsyncpa [#allocation4 + $0x1], 0  ;;  %s949_s15 = smov 0   ;;  %s951_s16 = smov 0  }
   0x5   :  { %s953_s17 = smov 0   ;;  %s955_s18 = smov 0  }
   0x6 LB: > { %s970_s19 = sadd.s32 4294967295, %s915_s18   ;;  %s532_s20 = sadd.s32 4294967294, %s915_s18   ;;  %s915_s18 = sphi %s955_s18, %s1194_s18   ;;  %s911_s17 = sphi %s953_s17, %s1193_s17   ;;  %s907_s16 = sphi %s951_s16, %s1192_s16   ;;  %s903_s15 = sphi %s949_s15, %s1191_s15  }
   0x7   : > { %p41_p0 = scmp.ne.s32.totalorder %s907_s16, %s903_s15  ;;  %p1175_p1 = scmp.eq.s32.totalorder %s970_s19, 0 }
   0x8   : > { %p134_p3 = scmp.eq.s32.totalorder %s532_s20, 1  ;;  %p533_p5 = scmp.ge.s32.totalorder %s915_s18, 1 }
   0x9   : > { %p979_p4 = por %p1175_p1, %p41_p0  ;;  %p141_p7 = scmp.lt.s32.totalorder %s915_s18, 3 }
   0xa   : > { %p984_p6 = por %p134_p3, %p41_p0  ;;  %s917_s24 = smov [#allocation5]  }
   0xb   : > { %s1178_s21 = scalar_select %p979_p4, 1, 0 }
   0xc   : > { %s1179_s22 = scalar_select %p984_p6, 1, 0 }
   0xd   : > { %p989_p8 = pnand %p533_p5, %p141_p7  ;;  %s153_s25 = sshll.u32 %s917_s24, 4  ;;  %s993_s25 = int_to_ptr.vmem [resolvable:$true] %s153_s25 }
   0xe   : > { %s1005_s27 = sadd.s32 1, %s915_s18   ;;  %s28_s28 = sadd.s32 1, %s911_s17 }
   0xf   : > { %s1180_s23 = scalar_select %p989_p8, 1, 0 }
  0x10   : > { %p730_p9 = pneg %p989_p8  ;;  %s25_s29 = ssub.s32 %s915_s18, %s1005_s27 }
  0x11   : > { %s787_s6 = scalar_lea.hbm %s1171_s1, 2048 }
  0x12   : > { %p1000_p11 = pnand %p730_p9, %p1175_p1  ;;  %p788_p12 = scmp.ne.s32.totalorder %s1171_s1, %s787_s6 }
  0x13   : > { %p794_p5 = scmp.lt.u32.totalorder %s787_s6, %s1171_s1 }
  0x14   : > { %p789_p13 = pneg %p1000_p11 }
  0x16   : > { %p790_p0 = pnand %p789_p13, %p788_p12 }
  0x18   : > { %p791_p3 = pneg %p790_p0 }
  0x1a   : > { %p796_p7 = pnand %p794_p5, %p791_p3 }
  0x1c   : > { %799 = shalt.err (!%p796_p7)
}
  0x1d   : > { %s800_s11 = scalar_lea.vmem %s993_s25, 2048  ;;  %p808_p2 = scmp.lt.s32.totalorder %s993_s25, %s993_s25 }
  0x1e   : > { %p801_p9 = scmp.ne.s32.totalorder %s993_s25, %s800_s11  ;;  %p809_p6 = scmp.lt.s32.totalorder %s800_s11, %s800_s11 }
  0x20   : > { %p803_p10 = pnand %p801_p9, %p789_p13  ;;  %p810_p4 = por %p809_p6, %p808_p2 }
  0x22   : > { %p804_p1 = pneg %p803_p10 }
  0x24   : > { %p811_p8 = pnand %p810_p4, %p804_p1 }
  0x26   : > { %814 = shalt.err (!%p811_p8)
}
  0x27   : > { %s918_s12 = smov 128   ;;  %s919_s13 = smov 8  }
  0x28   : > { %733 = dma.hbm_to_vmem [thread:$0]  (!%p1000_p11), %s1171_s1, 2048, %s993_s25, [#allocation6], %s918_s12, %s918_s12, %s919_s13  }
  0x29   : > { %p26_p1 = scmp.eq.s32.totalorder %s25_s29, 0  ;;  %p35_p2 = scmp.ne.s32.totalorder %s911_s17, %s907_s16 }
  0x2a   : > { %p36_p4 = scmp.eq.s32.totalorder %s915_s18, 0  ;;  %p743_p6 = scmp.lt.s32.totalorder %s915_s18, 2 }
  0x2b   : > { %s1039_s24 = scalar_select %p26_p1, %s911_s17, %s28_s28  }
  0x2c   : > { %p37_p8 = por %p36_p4, %p35_p2  ;;  %p1182_p10 = scmp.eq.s32.totalorder %s970_s19, 1 }
  0x2d   : > { %s173_s26 = sand.u32 1, %s911_s17   ;;  %s550_s5 = sshll.u32 %s915_s18, 8 }
  0x2e   : > { %p1043_p12 = por %p1182_p10, %p35_p2  ;;  %s536_s6 = sshll.u32 %s173_s26, 4 }
  0x2f   : > { %s1052_s9 = scalar_lea.hbm %s1170_s0, %s550_s5  ;;  %s177_s25 = scalar_lea.vmem [#allocation2], %s536_s6 }
  0x30   : > { %s184_s28 = sshll.u32 %s177_s25, 4  ;;  %p1054_p11 = pnand %p743_p6, %p37_p8  ;;  %s1058_s28 = int_to_ptr.vmem [resolvable:$true] %s184_s28 }
  0x31   : > { %s1060_s10 = scalar_lea.sflag [#allocation3], %s173_s26  ;;  %s815_s11 = scalar_lea.hbm %s1052_s9, 256 }
  0x32   : > { %p816_p13 = scmp.ne.s32.totalorder %s1052_s9, %s815_s11  ;;  %p817_p0 = pneg %p1054_p11 }
  0x33   : > { %s820_s5 = scalar_lea.hbm %s1170_s0, 512  ;;  %p821_p7 = scmp.lt.u32.totalorder %s1052_s9, %s1170_s0 }
  0x34   : > { %p818_p3 = pnand %p817_p0, %p816_p13  ;;  %p822_p9 = scmp.lt.u32.totalorder %s820_s5, %s815_s11 }
  0x35   : > { %p824_p2 = scmp.lt.u32.totalorder %s815_s11, %s1052_s9 }
  0x36   : > { %p819_p5 = pneg %p818_p3  ;;  %p823_p1 = por %p822_p9, %p821_p7 }
  0x38   : > { %p825_p4 = por %p824_p2, %p823_p1 }
  0x3a   : > { %p826_p6 = pnand %p825_p4, %p819_p5 }
  0x3c   : > { %829 = shalt.err (!%p826_p6)
}
  0x3d   : > { %s830_s26 = scalar_lea.vmem %s1058_s28, 256  ;;  %s920_s8 = smov [#allocation2]  }
  0x3e   : > { %p831_p8 = scmp.ne.s32.totalorder %s1058_s28, %s830_s26  ;;  %s835_s25 = sshll.u32 %s920_s8, 4  ;;  %s836_s25 = int_to_ptr.vmem [resolvable:$false] %s835_s25 }
  0x3f   : > { %s837_s14 = scalar_lea.vmem %s836_s25, 512  ;;  %p838_p3 = scmp.lt.s32.totalorder %s1058_s28, %s836_s25 }
  0x40   : > { %p833_p10 = pnand %p831_p8, %p817_p0  ;;  %p839_p7 = scmp.lt.s32.totalorder %s837_s14, %s830_s26 }
  0x42   : > { %p834_p13 = pneg %p833_p10  ;;  %p840_p9 = por %p839_p7, %p838_p3 }
  0x44   : > { %p841_p1 = pnand %p840_p9, %p834_p13 }
  0x46   : > { %844 = shalt.err (!%p841_p1)
}
  0x47   : > { %737 = dma.hbm_to_vmem [thread:$0]  (!%p1054_p11), %s1052_s9, 256, %s1058_s28, %s1060_s10, %s918_s12, %s918_s12, %s919_s13  }
  0x48   : > { %p1185_p0 = scmp.ne.s32.totalorder %s1180_s23, 0 }
  0x49   : > { %s1094_s11 = sand.u32 (!%p1185_p0), 1, %s907_s16   ;;  %p1186_p5 = scmp.ne.s32.totalorder (!%p1185_p0), %s1178_s21, 0 }
  0x4a   : > { %196 = sbr.rel (%p1185_p0) target bundleno = 589 (0x24d), region = 36  ;;  %s540_s20 = sshll.u32 (!%p1185_p0), %s1094_s11, 4 }
  0x4b   : > { %s199_s5 = scalar_lea.sflag (!%p1185_p0), [#allocation3], %s1094_s11  ;;  %s1100_s29 = scalar_lea.vmem (!%p1185_p0), [#allocation2], %s540_s20 }
  0x51   : > { %890 = dma.done.wait (%p1186_p5), %s199_s5, 256  }
  0x52   : > { %892 = vsyncadd (%p1186_p5), %s199_s5, 4294967040  ;;  %p1187_p11 = scmp.eq.s32.totalorder %s970_s19, 0 }
  0x54   : > { %894 = dma.done.wait (%p1187_p11), [#allocation6], 2048   ;;  %p1188_p2 = pmov %p1187_p11 }
  0x55   : > { %v235_v0 = vld [vmem:[#allocation5] sm:$0xff]  ;;  %v236_v1 = vld [vmem:[#allocation5 + $0x8] sm:$0xff]  ;;  %v237_v2 = vld [vmem:[#allocation5 + $0x10] sm:$0xff]  ;;  %s551_s9 = sshll.u32 %s970_s19, 8  ;;  %s230_s28 = scalar_lea.vmem [#allocation7], %s540_s20 }
  0x56   : > { %896 = vsyncadd (%p1188_p2), [#allocation6], 4294965248  ;;  %v658_v3 = vpack.c.bf16 %v236_v1, %v235_v0  ;;  %v238_v4 = vld [vmem:[#allocation5 + $0x18] sm:$0xff]  ;;  %v239_v6 = vld [vmem:[#allocation5 + $0x20] sm:$0xff]  ;;  %s449_s10 = sshll.u32 %s230_s28, 4  ;;  %s1124_s26 = scalar_lea.hbm %s1174_s4, %s551_s9  ;;  %s1126_s10 = int_to_ptr.vmem [resolvable:$true] %s449_s10 }
  0x57   : > { %v662_v5 = vpack.c.bf16 %v238_v4, %v237_v2  ;;  %v240_v7 = vld [vmem:[#allocation5 + $0x28] sm:$0xff]  ;;  %v233_v9 = vld [vmem:[%s1100_s29] sm:$0xff]  ;;  %v242_v11 = vld [vmem:[#allocation5 + $0x38] sm:$0xff]  ;;  %s436_s19 = scalar_lea.sflag [#allocation4], %s1094_s11  ;;  %s845_s8 = scalar_lea.vmem %s1126_s10, 256 }
  0x58   : > { %659 = vmatprep.subr.bf16.mxu0 %v658_v3  ;;  %691 = vmatprep.subr.bf16.mxu1 %v658_v3  ;;  %v666_v8 = vpack.c.bf16 %v240_v7, %v239_v6  ;;  %v241_v10 = vld [vmem:[#allocation5 + $0x30] sm:$0xff]  ;;  %v243_v13 = vld [vmem:[#allocation5 + $0x40] sm:$0xff]  ;;  %v244_v14 = vld [vmem:[#allocation5 + $0x48] sm:$0xff]  ;;  %p846_p4 = scmp.ne.s32.totalorder %s1126_s10, %s845_s8  ;;  %s921_s25 = smov [#allocation7]  }
  0x59   : > { %661 = vmatpush3.bf16.msra.mxu0 %v658_v3  ;;  %693 = vmatpush3.bf16.msra.mxu1 %v658_v3  ;;  %v670_v12 = vpack.c.bf16 %v242_v11, %v241_v10  ;;  %v674_v15 = vpack.c.bf16 %v244_v14, %v243_v13  ;;  %v245_v16 = vld [vmem:[#allocation5 + $0x50] sm:$0xff]  ;;  %v246_v17 = vld [vmem:[#allocation5 + $0x58] sm:$0xff]  ;;  %v247_v19 = vld [vmem:[#allocation5 + $0x60] sm:$0xff]  ;;  %s849_s14 = sshll.u32 %s921_s25, 4  ;;  %s850_s14 = int_to_ptr.vmem [resolvable:$false] %s849_s14 }
  0x5a   : > { %663 = vmatprep.subr.bf16.mxu0 %v662_v5  ;;  %695 = vmatprep.subr.bf16.mxu1 %v662_v5  ;;  %v678_v18 = vpack.c.bf16 %v246_v17, %v245_v16  ;;  %v248_v20 = vld [vmem:[#allocation5 + $0x68] sm:$0xff]  ;;  %v249_v22 = vld [vmem:[#allocation5 + $0x70] sm:$0xff]  ;;  %v250_v23 = vld [vmem:[#allocation5 + $0x78] sm:$0xff]  ;;  %p847_p6 = pnand %p846_p4, %p1043_p12  ;;  %s851_s20 = scalar_lea.vmem %s850_s14, 512 }
  0x5b   : > { %620 = vmatprep.mubr.f32.mxu0 %v233_v9  ;;  %v682_v21 = vpack.c.bf16 %v248_v20, %v247_v19  ;;  %v686_v24 = vpack.c.bf16 %v250_v23, %v249_v22  ;;  %v234_v25 = vld [vmem:[%s1100_s29 + $0x8] sm:$0xff]  ;;  %v543_v41 = vld [vmem:[%s1172_s2] ss:$0 sm:$0xff]  ;;  %p852_p10 = scmp.lt.s32.totalorder %s1126_s10, %s850_s14  ;;  %p853_p13 = scmp.lt.s32.totalorder %s851_s20, %s845_s8 }
  0x5c   : > { %v544_v44 = vld [vmem:[%s1173_s3] ss:$0 sm:$0xff]  ;;  %p848_p8 = pneg %p847_p6 }
  0x5d   : > { %665 = vmatpush3.bf16.msra.mxu0 %v662_v5  ;;  %697 = vmatpush3.bf16.msra.mxu1 %v662_v5  ;;  %p854_p3 = por %p853_p13, %p852_p10 }
  0x5e   : > { %667 = vmatprep.subr.bf16.mxu0 %v666_v8  ;;  %699 = vmatprep.subr.bf16.mxu1 %v666_v8 }
  0x5f   : > { %p855_p7 = pnand %p854_p3, %p848_p8 }
  0x61   : > { %669 = vmatpush3.bf16.msra.mxu0 %v666_v8  ;;  %701 = vmatpush3.bf16.msra.mxu1 %v666_v8 }
  0x62   : > { %671 = vmatprep.subr.bf16.mxu0 %v670_v12  ;;  %703 = vmatprep.subr.bf16.mxu1 %v670_v12 }
  0x65   : > { %673 = vmatpush3.bf16.msra.mxu0 %v670_v12  ;;  %705 = vmatpush3.bf16.msra.mxu1 %v670_v12 }
  0x66   : > { %675 = vmatprep.subr.bf16.mxu0 %v674_v15  ;;  %707 = vmatprep.subr.bf16.mxu1 %v674_v15 }
  0x69   : > { %677 = vmatpush3.bf16.msra.mxu0 %v674_v15  ;;  %709 = vmatpush3.bf16.msra.mxu1 %v674_v15 }
  0x6a   : > { %679 = vmatprep.subr.bf16.mxu0 %v678_v18  ;;  %711 = vmatprep.subr.bf16.mxu1 %v678_v18 }
  0x6d   : > { %681 = vmatpush3.bf16.msra.mxu0 %v678_v18  ;;  %713 = vmatpush3.bf16.msra.mxu1 %v678_v18 }
  0x6e   : > { %683 = vmatprep.subr.bf16.mxu0 %v682_v21  ;;  %715 = vmatprep.subr.bf16.mxu1 %v682_v21 }
  0x71   : > { %685 = vmatpush3.bf16.msra.mxu0 %v682_v21  ;;  %717 = vmatpush3.bf16.msra.mxu1 %v682_v21 }
  0x72   : > { %687 = vmatprep.subr.bf16.mxu0 %v686_v24  ;;  %719 = vmatprep.subr.bf16.mxu1 %v686_v24 }
  0x75   : > { %689 = vmatpush3.bf16.msra.mxu0 %v686_v24  ;;  %721 = vmatpush3.bf16.msra.mxu1 %v686_v24 }
  0x78   : > { %621 = vmatmul.mubr.f32.vlgmr.msra.gmra.mrb[0].mxu0 %v234_v25 }
 0x14b   : > { %v622_v26 = vpop.f32.mrb[0].mxu0 }
 0x14c   : > { %v327_v27 = vmul.f32 0.03125, %v622_v26  ;;  %v317_v28 = vpop.f32.mrb[1].mxu0 }
 0x14d   : > { %v326_v29 = vmul.f32 0.03125, %v317_v28 }
 0x14e   : > { %v329_v30 = vsub.f32 %v234_v25, %v327_v27 }
 0x14f   : > { %v328_v31 = vsub.f32 %v233_v9, %v326_v29 }
 0x150   : > { %v331_v33 = vmul.f32 %v329_v30, %v329_v30 }
 0x151   : > { %v330_v32 = vmul.f32 %v328_v31, %v328_v31 }
 0x153   : > { %655 = vmatprep.mubr.f32.mxu1 %v330_v32 }
 0x154   : > { %656 = vmatmul.mubr.f32.vlgmr.msra.gmra.mrb[0].mxu1 %v331_v33 }
 0x227   : > { %v657_v34 = vpop.f32.mrb[0].mxu1 }
 0x228   : > { %v408_v35 = vmul.f32 0.03125, %v657_v34  ;;  %v398_v36 = vpop.f32.mrb[1].mxu1 }
 0x229   : > { %v407_v37 = vmul.f32 0.03125, %v398_v36 }
 0x22a   : > { %v410_v38 = vadd.f32 1e-05, %v408_v35 }
 0x22b   : > { %v409_v39 = vadd.f32 1e-05, %v407_v37 }
 0x22c   : > { %783 = vrsqrt.f32 %v410_v38 }
 0x22d   : > { %785 = vrsqrt.f32 %v409_v39 }
 0x236   : > { %v784_v40 = vpop.eup %783 }
 0x237   : > { %v786_v42 = vpop.eup %785  ;;  %v414_v43 = vmul.f32 %v784_v40, %v329_v30 }
 0x238   : > { %v413_v45 = vmul.f32 %v786_v42, %v328_v31 }
 0x239   : > { %v423_v46 = vmul.f32 %v543_v41, %v414_v43 }
 0x23a   : > { %v422_v47 = vmul.f32 %v543_v41, %v413_v45 }
 0x23b   : > { %v432_v48 = vadd.f32 %v544_v44, %v423_v46 }
 0x23c   : > { %v431_v49 = vadd.f32 %v544_v44, %v422_v47 }
 0x23d   : > { %434 = vst [vmem:[%s230_s28 + $0x8] sm:$0xff] %v432_v48 }
 0x23e   : > { %433 = vst [vmem:[%s230_s28] sm:$0xff] %v431_v49 }
 0x23f   : > { %858 = shalt.err (!%p855_p7)
}
 0x240   : > { %s859_s5 = scalar_lea.hbm %s1124_s26, 256  ;;  %s863_s23 = scalar_lea.hbm %s1174_s4, 512 }
 0x241   : > { %p860_p9 = scmp.ne.s32.totalorder %s1124_s26, %s859_s5  ;;  %p864_p5 = scmp.lt.u32.totalorder %s1124_s26, %s1174_s4 }
 0x242   : > { %p865_p11 = scmp.lt.u32.totalorder %s863_s23, %s859_s5  ;;  %p867_p4 = scmp.lt.u32.totalorder %s859_s5, %s1124_s26 }
 0x243   : > { %p861_p1 = pnand %p860_p9, %p1043_p12 }
 0x244   : > { %p866_p2 = por %p865_p11, %p864_p5 }
 0x245   : > { %p862_p0 = pneg %p861_p1 }
 0x246   : > { %p868_p6 = por %p867_p4, %p866_p2 }
 0x248   : > { %p869_p8 = pnand %p868_p6, %p862_p0 }
 0x24a   : > { %872 = shalt.err (!%p869_p8)
}
 0x24b   : > { %s922_s9 = smov 128   ;;  %s923_s28 = smov 8  }
 0x24c   : > { %728 = dma.vmem_to_hbm [thread:$0]  (%p1043_p12), %s1126_s10, 256, %s1124_s26, %s436_s19, %s922_s9, %s922_s9, %s923_s28  }
 0x24d PF: > { %s464_s6 = sand.u32 1, %s903_s15   ;;  %p1189_p10 = scmp.ne.s32.totalorder %s1179_s22, 0 }
 0x24e   : > { %p1190_p13 = scmp.ge.s32.totalorder %s915_s18, 2  ;;  %s465_s7 = scalar_lea.sflag [#allocation4], %s464_s6 }
 0x250   : > { %p739_p3 = pnand %p1190_p13, %p1189_p10 }
 0x252   : > { %898 = dma.done.wait (!%p739_p3), %s465_s7, 256  }
 0x253   : > { %900 = vsyncadd (!%p739_p3), %s465_s7, 4294967040  ;;  %p18_p7 = scmp.ge.s32.totalorder %s1005_s27, 4   ;;  %s1191_s15 = smov %s907_s16 }
 0x254   : > { %s1192_s16 = smov %s911_s17  ;;  %s1193_s17 = smov %s1039_s24 }
 0x255   : > { %s1194_s18 = smov %s1005_s27  ;;  %20 = sbr.rel (!%p18_p7) target bundleno = 6 (0x6), region = 85 }
 0x25c   :  { %470 = vsyncpa [#allocation3], 1 }
 0x25d   :  { %472 = vsyncpa [#allocation3 + $0x1], 1 }
 0x25e   :  { %473 = vsyncpa [#allocation6], 1 }
 0x25f   :  { %474 = vsyncpa [#allocation4], 1 }
 0x260   :  { %476 = vsyncpa [#allocation4 + $0x1], 1 }

</bundles_post_ra>
